<compile_context>
chip_gen: v5e
topology: v5e:2x2
jax: 0.10.0
libtpu: 0.0.40
codegen_flags: <defaults>
</compile_context>

<pallas_src>
import math

import jax
import jax.numpy as jnp
import numpy as np
from jax.experimental import pallas as pl
from jax.experimental.pallas import tpu as pltpu


def _round_up(n, m):
    return ((n + m - 1) // m) * m


def _mlp_policy_kernel(xt_ref, w1_ref, b1_ref, w2_ref, b2_ref, o_ref):
    xt = xt_ref[...]          # (D, TB)  current batch tile, batch on lanes
    w1 = w1_ref[...]          # (H, D)   first-layer weight (VMEM-resident)
    b1 = b1_ref[...]          # (H, 1)   first-layer bias as a column
    w2 = w2_ref[...]          # (1, H)   second-layer weight as a row
    b2 = b2_ref[0, 0]         # scalar   second-layer bias (SMEM)

    # Layer 1 on the MXU: (H, D) x (D, TB) -> (H, TB); bias broadcasts on lanes.
    h = jnp.dot(w1, xt, preferred_element_type=jnp.float32) + b1

    # leaky_relu (negative_slope = 0.01, PyTorch default): 2 VPU ops (mul+max).
    a = jnp.maximum(h, 0.01 * h)                         # (H, TB)

    # Layer 2 on the MXU: (1, H) x (H, TB) -> dense (1, TB) output row.
    y = jnp.dot(w2, a, preferred_element_type=jnp.float32) + b2

    o_ref[...] = y.astype(o_ref.dtype)                   # lane-dense row store


def flexible_policy_forward(x, w1, b1, w2, b2, *, block_b=8192):
    """y = Linear2(leaky_relu(Linear1(x)));  x: (B, D) f32 -> (B, 1) f32.

    block_b: max batch-tile size (multiple of 128).  Large tiles amortize the
    per-grid-step pipeline overhead; with the transposed (D, TB) x layout the
    per-step VMEM footprint stays tiny even at TB = 8192+.
    """
    assert block_b % 128 == 0
    B, D = x.shape
    H = w1.shape[0]

    # Batch tile: multiple of 128 (lane granularity), capped by block_b.
    B_128 = _round_up(B, 128)
    TB = min(block_b, B_128)
    B_pad = _round_up(B_128, TB)
    num_tiles = B_pad // TB

    # Transpose so batch lives on the lane axis; pad the batch (lane) dim.
    x_t = jnp.transpose(x.astype(jnp.float32))           # (D, B)
    if B_pad != B:
        x_t = jnp.pad(x_t, ((0, 0), (0, B_pad - B)))

    b1_col = b1.reshape(H, 1).astype(jnp.float32)
    w2_row = w2.reshape(1, H).astype(jnp.float32)
    b2_smem = b2.reshape(1, 1).astype(jnp.float32)

    out = pl.pallas_call(
        _mlp_policy_kernel,
        out_shape=jax.ShapeDtypeStruct((1, B_pad), jnp.float32),
        grid=(num_tiles,),
        in_specs=[
            # x^T: streamed lane-dense (D, TB) batch tiles (double-buffered).
            pl.BlockSpec((D, TB), lambda i: (0, i)),
            # weights / first bias: constant index_map -> stay VMEM-resident.
            pl.BlockSpec((H, D), lambda i: (0, 0)),
            pl.BlockSpec((H, 1), lambda i: (0, 0)),
            pl.BlockSpec((1, H), lambda i: (0, 0)),
            # scalar second-layer bias lives in SMEM (scalar path).
            pl.BlockSpec(memory_space=pltpu.MemorySpace.SMEM),
        ],
        # Lane-dense output: one dense (1, TB) row slice per grid step.
        out_specs=pl.BlockSpec((1, TB), lambda i: (0, i)),
        compiler_params=pltpu.CompilerParams(
            dimension_semantics=("parallel",),   # shard batch tiles across TCs
        ),
    )(x_t, w1.astype(jnp.float32), b1_col, w2_row, b2_smem)

    # (1, B_pad) -> (B, 1), dropping padded batch columns.
    return out[0, :B].reshape(B, 1)


def make_params(dim_x, hidden, key):
    """Deterministic init mimicking nn.Linear default init (PyTorch layout)."""
    k1w, k1b, k2w, k2b = jax.random.split(key, 4)
    bound1 = 1.0 / math.sqrt(dim_x)
    w1 = jax.random.uniform(k1w, (hidden, dim_x), jnp.float32, -bound1, bound1)
    b1 = jax.random.uniform(k1b, (hidden,), jnp.float32, -bound1, bound1)
    bound2 = 1.0 / math.sqrt(hidden)
    w2 = jax.random.uniform(k2w, (1, hidden), jnp.float32, -bound2, bound2)
    b2 = jax.random.uniform(k2b, (1,), jnp.float32, -bound2, bound2)
    return w1, b1, w2, b2


if __name__ == "__main__":
    dim_x = 8
    hidden = 50     # fixed by the module
    batch = 200     # not a multiple of the tile -> exercises padding + 2-tile grid

    key = jax.random.PRNGKey(0)
    kx, kp = jax.random.split(key)
    x = jax.random.normal(kx, (batch, dim_x), jnp.float32)
    w1, b1, w2, b2 = make_params(dim_x, hidden, kp)

    # Use a small tile in the demo so the grid actually has >1 step.
    out = flexible_policy_forward(x, w1, b1, w2, b2, block_b=128)
    out = jax.block_until_ready(out)

    # Pure-JAX reference of the PyTorch forward.
    h = x @ w1.T + b1[None, :]
    a = jnp.where(h > 0, h, 0.01 * h)
    ref = a @ w2.T + b2[None, :]
    np.testing.assert_allclose(np.asarray(out), np.asarray(ref), rtol=1e-5, atol=1e-5)

    print("KERNEL_OK")
</pallas_src>

<mosaic_0001>
module attributes {stable_mosaic.version = 11 : i64} {
  func.func @_mlp_policy_kernel(%arg0: i32, %arg1: memref<8x128xf32, #tpu.memory_space<vmem>>, %arg2: memref<50x8xf32, #tpu.memory_space<vmem>>, %arg3: memref<50x1xf32, #tpu.memory_space<vmem>>, %arg4: memref<1x50xf32, #tpu.memory_space<vmem>>, %arg5: memref<1x1xf32, #tpu.memory_space<smem>>, %arg6: memref<1x128xf32, #tpu.memory_space<vmem>>) attributes {dimension_semantics = [#tpu.dimension_semantics<parallel>], iteration_bounds = array<i64: 2>, scalar_prefetch = 0 : i64, scratch_operands = 0 : i64, tpu.core_type = #tpu.core_type<tc>, window_params = [{transform_indices = @transform_0, window_bounds = array<i64: 8, 128>}, {pipeline_mode = #tpu.pipeline_mode<synchronous>, transform_indices = @transform_1, window_bounds = array<i64: 50, 8>}, {pipeline_mode = #tpu.pipeline_mode<synchronous>, transform_indices = @transform_2, window_bounds = array<i64: 50, 1>}, {pipeline_mode = #tpu.pipeline_mode<synchronous>, transform_indices = @transform_3, window_bounds = array<i64: 1, 50>}, {transform_indices = @transform_4, window_bounds = array<i64: 1, 1>}, {transform_indices = @transform_5, window_bounds = array<i64: 1, 128>}]} {
    %c0 = arith.constant 0 : index
    %c0_0 = arith.constant 0 : index
    %0 = vector.load %arg1[%c0, %c0_0] : memref<8x128xf32, #tpu.memory_space<vmem>>, vector<8x128xf32>
    %c0_1 = arith.constant 0 : index
    %c0_2 = arith.constant 0 : index
    %1 = vector.load %arg2[%c0_1, %c0_2] : memref<50x8xf32, #tpu.memory_space<vmem>>, vector<50x8xf32>
    %c0_3 = arith.constant 0 : index
    %c0_4 = arith.constant 0 : index
    %2 = vector.load %arg3[%c0_3, %c0_4] : memref<50x1xf32, #tpu.memory_space<vmem>>, vector<50x1xf32>
    %c0_5 = arith.constant 0 : index
    %c0_6 = arith.constant 0 : index
    %3 = vector.load %arg4[%c0_5, %c0_6] : memref<1x50xf32, #tpu.memory_space<vmem>>, vector<1x50xf32>
    %c0_7 = arith.constant 0 : index
    %c0_8 = arith.constant 0 : index
    %4 = memref.load %arg5[%c0_7, %c0_8] : memref<1x1xf32, #tpu.memory_space<smem>>
    %cst = arith.constant dense<0.000000e+00> : vector<50x128xf32>
    %5 = tpu.matmul %1, %0, %cst {dimension_numbers = #tpu.dot_dimension_numbers<[1], [0], [0], [1], [0, 0, 1, 1], [], []>} : vector<50x8xf32>, vector<8x128xf32>, vector<50x128xf32> -> vector<50x128xf32>
    %6 = vector.broadcast %2 : vector<50x1xf32> to vector<50x128xf32>
    %7 = arith.addf %5, %6 : vector<50x128xf32>
    %cst_9 = arith.constant 0.00999999977 : f32
    %8 = vector.broadcast %cst_9 : f32 to vector<50x128xf32>
    %9 = arith.mulf %8, %7 : vector<50x128xf32>
    %10 = arith.maximumf %7, %9 : vector<50x128xf32>
    %cst_10 = arith.constant dense<0.000000e+00> : vector<1x128xf32>
    %11 = tpu.matmul %3, %10, %cst_10 {dimension_numbers = #tpu.dot_dimension_numbers<[1], [0], [0], [1], [0, 0, 1, 1], [], []>} : vector<1x50xf32>, vector<50x128xf32>, vector<1x128xf32> -> vector<1x128xf32>
    %12 = vector.broadcast %4 : f32 to vector<1x128xf32>
    %13 = arith.addf %11, %12 : vector<1x128xf32>
    %c0_11 = arith.constant 0 : index
    %c0_12 = arith.constant 0 : index
    %14 = vector.load %arg6[%c0_11, %c0_12] : memref<1x128xf32, #tpu.memory_space<vmem>>, vector<1x128xf32>
    tpu.vector_store %arg6[%c0_11, %c0_12], %13 {strides = array<i32>} : memref<1x128xf32, #tpu.memory_space<vmem>>, vector<1x128xf32>,
    return
  }
  func.func @transform_0(%arg0: i32) -> (i32, i32) {
    %c0_i32 = arith.constant 0 : i32
    %c0_i32_0 = arith.constant 0 : i32
    return %c0_i32, %arg0 : i32, i32
  }
  func.func @transform_1(%arg0: i32) -> (i32, i32) {
    %c0_i32 = arith.constant 0 : i32
    %c0_i32_0 = arith.constant 0 : i32
    %c0_i32_1 = arith.constant 0 : i32
    return %c0_i32, %c0_i32_0 : i32, i32
  }
  func.func @transform_2(%arg0: i32) -> (i32, i32) {
    %c0_i32 = arith.constant 0 : i32
    %c0_i32_0 = arith.constant 0 : i32
    %c0_i32_1 = arith.constant 0 : i32
    return %c0_i32, %c0_i32_0 : i32, i32
  }
  func.func @transform_3(%arg0: i32) -> (i32, i32) {
    %c0_i32 = arith.constant 0 : i32
    %c0_i32_0 = arith.constant 0 : i32
    %c0_i32_1 = arith.constant 0 : i32
    return %c0_i32, %c0_i32_0 : i32, i32
  }
  func.func @transform_4(%arg0: i32) -> (i32, i32) {
    %c0_i32 = arith.constant 0 : i32
    %c0_i32_0 = arith.constant 0 : i32
    %c0_i32_1 = arith.constant 0 : i32
    return %c0_i32, %c0_i32_0 : i32, i32
  }
  func.func @transform_5(%arg0: i32) -> (i32, i32) {
    %c0_i32 = arith.constant 0 : i32
    %c0_i32_0 = arith.constant 0 : i32
    return %c0_i32, %arg0 : i32, i32
  }
}

</mosaic_0001>

<bundles_post_ra>
// kernel: tpu_custom_call.1
= control target key start
LH: loop header
LB: loop body
LE: loop exit
PB: predicated region body
PF: predicated region fallthrough
CT: control target
= control target key end

     0   :  { %s740_s0 = inlined_call_operand.vmem [shape: f32[8,256], index: 0, kind: input, shape index: {}]   ;;  %s741_s1 = inlined_call_operand.vmem [shape: f32[50,8], index: 1, kind: input, shape index: {}]   ;;  %s742_s2 = inlined_call_operand.vmem [shape: f32[50,1], index: 2, kind: input, shape index: {}]   ;;  %s743_s3 = inlined_call_operand.vmem [shape: f32[1,50], index: 3, kind: input, shape index: {}]   ;;  %s744_s4 = inlined_call_operand.<no memory space> [shape: f32[1,1], index: 4, kind: input, shape index: {}]   ;;  %s745_s5 = inlined_call_operand.hbm [shape: f32[1,256], index: 5, kind: output, shape index: {}]  }
   0x1   :  { %10 = sst [smem:[#allocation2]] %s744_s4 }
   0x2   :  { %11 = vsyncpa [#allocation4], 0 }
   0x3   :  { %13 = vsyncpa [#allocation4 + $0x1], 0  ;;  %s603_s20 = smov 0   ;;  %s605_s21 = smov 0  }
   0x4   :  { %s607_s22 = smov 0   ;;  %s609_s23 = smov 0  }
   0x5 LB: > { %s624_s4 = sadd.s32 4294967295, %s567_s23   ;;  %s444_s24 = sadd.s32 4294967294, %s567_s23   ;;  %s567_s23 = sphi %s609_s23, %s751_s23   ;;  %s563_s22 = sphi %s607_s22, %s750_s22   ;;  %s559_s21 = sphi %s605_s21, %s749_s21   ;;  %s555_s20 = sphi %s603_s20, %s748_s20  }
   0x6   : > { %s628_s25 = sadd.s32 1, %s567_s23   ;;  %s136_s26 = sadd.s32 1, %s563_s22 }
   0x7   : > { %s133_s27 = ssub.s32 %s567_s23, %s628_s25  ;;  %p146_p0 = scmp.ne.s32.totalorder %s563_s22, %s559_s21 }
   0x8   : > { %p134_p1 = scmp.eq.s32.totalorder %s133_s27, 0  ;;  %p147_p2 = scmp.eq.s32.totalorder %s624_s4, 1 }
   0x9   : > { %p152_p3 = scmp.ne.s32.totalorder %s559_s21, %s555_s20  ;;  %p153_p4 = scmp.eq.s32.totalorder %s444_s24, 1 }
   0xa   : > { %s639_s28 = scalar_select %p134_p1, %s563_s22, %s136_s26  }
   0xb   : > { %p641_p5 = por %p147_p2, %p146_p0  ;;  %p645_p6 = por %p153_p4, %p152_p3 }
   0xc   : > { %p447_p7 = scmp.ge.s32.totalorder %s567_s23, 1  ;;  %p190_p8 = scmp.lt.s32.totalorder %s567_s23, 3 }
   0xe   : > { %p191_p9 = pnand %p447_p7, %p190_p8 }
   0xf   : > { %p216_p10 = scmp.lt.s32.totalorder (!%p191_p9), %s624_s4, 1  ;;  %s236_s7 = sld [smem:[#allocation2]] (!%p191_p9) }
  0x10   : > { %194 = sbr.rel (%p191_p9) target bundleno = 325 (0x145), region = 40 }
  0x15   : > { %v569_v0 = vmov 0   ;;  %v234_v1 = vld [vmem:[%s742_s2 + $0x30] sm:$0x3]  ;;  %s217_s8 = scalar_select %p216_p10, %s624_s4, 1  ;;  %v232_v2 = vld [vmem:[%s742_s2 + $0x20] sm:$0xff]  ;;  %vm272_vm0 = vcmask 64512   ;;  %v346_v52 = vstv %s236_s7 }
  0x16   : > { %502 = vset.pattern.permute.xlu0 %v569_v0  ;;  %503 = vset.pattern.permute.xlu1 %v569_v0  ;;  %v230_v3 = vld [vmem:[%s742_s2 + $0x10] sm:$0xff]  ;;  %v225_v4 = vld [vmem:[%s741_s1 + $0x20] sm:$0xff]  ;;  %v224_v7 = vld [vmem:[%s741_s1 + $0x18] sm:$0xff]  ;;  %vm351_vm1 = vcmask 1041408   ;;  %vm347_vm2 = vcmask 408576  }
  0x17   : > { %269 = vperm.xlu0 %502, %v234_v1   ;;  %504 = vset.pattern.permute.xlu2 %v569_v0  ;;  %s448_s11 = sshll.u32 %s217_s8, 3  ;;  %v221_v5 = vld [vmem:[%s741_s1] sm:$0xff]  ;;  %v233_v8 = vld [vmem:[%s742_s2 + $0x28] sm:$0xff]  ;;  %v231_v9 = vld [vmem:[%s742_s2 + $0x18] sm:$0xff]  ;;  %s214_s8 = sand.u32 1, %s559_s21  }
  0x18   : > { %259 = vperm.xlu1 %503, %v232_v2   ;;  %s219_s16 = scalar_lea.vmem %s740_s0, %s448_s11  ;;  %249 = vperm.xlu2 %504, %v230_v3   ;;  %v229_v10 = vld [vmem:[%s742_s2 + $0x8] sm:$0xff]  ;;  %v228_v13 = vld [vmem:[%s742_s2] sm:$0xff]  ;;  %v227_v14 = vld [vmem:[%s741_s1 + $0x30] sm:$0x3]  ;;  %s385_s11 = scalar_lea.hbm %s745_s5, %s624_s4 }
  0x19   : > { %v220_v6 = vld [vmem:[%s219_s16] sm:$0xff]  ;;  %v226_v11 = vld [vmem:[%s741_s1 + $0x28] sm:$0xff]  ;;  %v223_v15 = vld [vmem:[%s741_s1 + $0x10] sm:$0xff]  ;;  %s215_s12 = scalar_lea.vmem [#allocation3], %s214_s8  ;;  %s389_s14 = sshll.u32 %s385_s11, 4  ;;  %s390_s14 = int_to_ptr.hbm [resolvable:$true] %s389_s14 }
  0x1a   : > { %461 = vmatpush.msra.mxu3 %v220_v6  ;;  %309 = vmatpush.msra.mxu0 %v220_v6  ;;  %v222_v12 = vld [vmem:[%s741_s1 + $0x8] sm:$0xff]  ;;  %v235_v51 = vld [vmem:[%s743_s3] sm:$0x1]  ;;  %s387_s13 = sshll.u32 %s215_s12, 4  ;;  %s377_s15 = scalar_lea.sflag [#allocation4], %s214_s8  ;;  %s388_s13 = int_to_ptr.vmem [resolvable:$true] %s387_s13 }
  0x1b   : > { %453 = vmatmul.msk.f32.vlgmr.msra.gmra.mxu3 %vm272_vm0, %v225_v4  ;;  %449 = vmatmul.msk.f32.vlgmr.msra.gmra.mxu0 %vm272_vm0, %v221_v5  ;;  %s519_s16 = sshra.s32 %s390_s14, 4  ;;  %s525_s4 = scalar_lea.hbm %s745_s5, 2  ;;  %s520_s16 = int_to_ptr.hbm [resolvable:$true] %s519_s16 }
  0x1c   : > { %460 = vmatpush.msra.mxu2 %v220_v6  ;;  %s521_s17 = scalar_lea.hbm %s520_s16, 1  ;;  %p526_p0 = scmp.lt.s32.totalorder %s520_s16, %s745_s5 }
  0x1d   : > { %452 = vmatmul.msk.f32.vlgmr.msra.gmra.mxu2 %vm272_vm0, %v224_v7  ;;  %p522_p11 = scmp.ne.s32.totalorder %s520_s16, %s521_s17  ;;  %p527_p1 = scmp.lt.s32.totalorder %s525_s4, %s521_s17 }
  0x1f   : > { %264 = vperm.xlu0 %502, %v233_v8   ;;  %p523_p12 = pnand %p522_p11, %p641_p5  ;;  %p528_p2 = por %p527_p1, %p526_p0 }
  0x20   : > { %254 = vperm.xlu1 %503, %v231_v9   ;;  %244 = vperm.xlu2 %504, %v229_v10  }
  0x21   : > { %p524_p13 = pneg %p523_p12 }
  0x23   : > { %454 = vmatmul.msk.f32.gmra.mxu3 %vm272_vm0, %v226_v11  ;;  %450 = vmatmul.msk.f32.gmra.mxu0 %vm272_vm0, %v222_v12  ;;  %p529_p3 = pnand %p528_p2, %p524_p13 }
  0x27   : > { %239 = vperm.xlu0 %502, %v228_v13  }
  0x2b   : > { %455 = vmatmul.msk.f32.gmra.mxu3 %vm272_vm0, %v227_v14  ;;  %451 = vmatmul.msk.f32.gmra.mxu0 %vm272_vm0, %v223_v15 }
  0x72   : > { %v250_v22 = vpop.permute.xlu2 %249 }
  0x7a   : > { %v245_v34 = vpop.permute.xlu2 %244 }
  0x89   : > { %v270_v18 = vpop.permute.xlu0 %269 }
  0x8a   : > { %v260_v19 = vpop.permute.xlu1 %259 }
  0x91   : > { %v265_v23 = vpop.permute.xlu0 %264 }
  0x92   : > { %v255_v25 = vpop.permute.xlu1 %254 }
  0x98   : > { %v311_v16 = vpop.f32.mrf.mxu0 }
  0x99   : > { %v240_v38 = vpop.permute.xlu0 %239 }
  0x9a   : > { %v312_v42 = vadd.f32 %v311_v16, %v240_v38 }
  0x9c   : > { %v332_v47 = vmul.f32 0.01, %v312_v42 }
  0x9e   : > { %v323_v17 = vpop.f32.mrf.mxu3  ;;  %v339_v50 = vmax.f32 %v312_v42, %v332_v47 }
  0x9f   : > { %v324_v28 = vadd.f32 %v323_v17, %v260_v19 }
  0xa0   : > { %v314_v20 = vpop.f32.mrf.mxu0  ;;  %v320_v26 = vpop.f32.mrf.mxu2 }
  0xa1   : > { %v321_v32 = vadd.f32 %v320_v26, %v255_v25  ;;  %v336_v35 = vmul.f32 0.01, %v324_v28  ;;  %v315_v40 = vadd.f32 %v314_v20, %v245_v34 }
  0xa3   : > { %v335_v39 = vmul.f32 0.01, %v321_v32  ;;  %v343_v44 = vmax.f32 %v324_v28, %v336_v35  ;;  %v333_v45 = vmul.f32 0.01, %v315_v40 }
  0xa5   : > { %v342_v46 = vmax.f32 %v321_v32, %v335_v39  ;;  %v340_v49 = vmax.f32 %v315_v40, %v333_v45 }
  0xa6   : > { %v326_v21 = vpop.f32.mrf.mxu3 }
  0xa7   : > { %v327_v24 = vadd.f32 %v326_v21, %v265_v23 }
  0xa8   : > { %v317_v30 = vpop.f32.mrf.mxu0 }
  0xa9   : > { %v337_v31 = vmul.f32 0.01, %v327_v24  ;;  %v318_v36 = vadd.f32 %v317_v30, %v250_v22 }
  0xab   : > { %v344_v41 = vmax.f32 %v327_v24, %v337_v31  ;;  %v334_v43 = vmul.f32 0.01, %v318_v36 }
  0xad   : > { %v341_v48 = vmax.f32 %v318_v36, %v334_v43 }
  0xae   : > { %v329_v27 = vpop.f32.mrf.mxu3 }
  0xaf   : > { %v330_v29 = vadd.f32 %v329_v27, %v270_v18 }
  0xb1   : > { %v338_v33 = vmul.f32 0.01, %v330_v29 }
  0xb3   : > { %v345_v37 = vmax.f32 %v330_v29, %v338_v33 }
  0xb5   : > { %456 = vmatpush.msk.msra.mxu1 %vm351_vm1, %v345_v37 }
  0xb7   : > { %365 = vmatpush.msra.mxu1 %v344_v41 }
  0xb9   : > { %366 = vmatpush.msra.mxu1 %v343_v44 }
  0xbb   : > { %367 = vmatpush.msra.mxu1 %v342_v46 }
  0xbd   : > { %368 = vmatpush.msra.mxu1 %v341_v48 }
  0xbf   : > { %369 = vmatpush.msra.mxu1 %v340_v49 }
  0xc1   : > { %370 = vmatpush.msra.mxu1 %v339_v50 }
  0xc2   : > { %457 = vmatmul.msk.f32.vlgmr.msra.gmra.mxu1 %vm347_vm2, %v235_v51 }
 0x13f   : > { %v372_v53 = vpop.f32.mrf.mxu1 }
 0x140   : > { %v373_v54 = vadd.f32 %v372_v53, %v346_v52 }
 0x142   : > { %375 = vst [vmem:[%s215_s12] sm:$0x1] %v373_v54 }
 0x143   : > { %532 = shalt.err (!%p529_p3)
}
 0x144   : > { %462 = dma.vmem_to_hbm [thread:$0]  (%p641_p5), %s388_s13, 16, %s390_s14, %s377_s15  }
 0x145 PF: > { %p468_p4 = scmp.ge.s32.totalorder %s567_s23, 2  ;;  %s401_s27 = sand.u32 1, %s555_s20  }
 0x146   : > { %s402_s6 = scalar_lea.sflag [#allocation4], %s401_s27 }
 0x147   : > { %p465_p7 = pnand %p468_p4, %p645_p6 }
 0x149   : > { %p466_p8 = pneg %p465_p7 }
 0x14b   : > { %550 = dma.done.wait (%p466_p8), %s402_s6, 16  }
 0x14c   : > { %552 = vsyncadd (%p466_p8), %s402_s6, 4294967280  ;;  %p16_p9 = scmp.ge.s32.totalorder %s628_s25, 4   ;;  %s748_s20 = smov %s559_s21 }
 0x14d   : > { %s749_s21 = smov %s563_s22  ;;  %s750_s22 = smov %s639_s28 }
 0x14e   : > { %s751_s23 = smov %s628_s25  ;;  %18 = sbr.rel (!%p16_p9) target bundleno = 5 (0x5), region = 75 }
 0x153   :  { %407 = vsyncpa [#allocation4], 1 }
 0x154   :  { %409 = vsyncpa [#allocation4 + $0x1], 1 }

</bundles_post_ra>
